<compile_context>
chip_gen: v7x
topology: tpu7x:2x2x1
jax: 0.10.0
libtpu: 0.0.40
codegen_flags: <defaults>
</compile_context>

<pallas_src>
import functools

import numpy as np

import jax
import jax.numpy as jnp
from jax.experimental import pallas as pl
from jax.experimental.pallas import tpu as pltpu


# ----------------------------------------------------------------------------------------------
# Hardware-aware constants (VMEM budget per generation, MXU-aligned tile granularity).
# ----------------------------------------------------------------------------------------------
def _tpu_vmem_capacity_bytes() -> int:
    try:
        info = pltpu.get_tpu_info()
        cap = getattr(info, "vmem_capacity_bytes", None)
        if cap:
            return int(cap)
    except Exception:  # noqa: BLE001 - fall back to a conservative (v7x-sized) default
        pass
    return 64 << 20


_VMEM_PHYS = _tpu_vmem_capacity_bytes()
# Scoped VMEM limit handed to Mosaic: ~75% of physical (96 MiB on v5e/v6e, 48 MiB on v7x).
_VMEM_LIMIT = min((_VMEM_PHYS * 3) // 4, 100 << 20)
# What our own tile-size accounting may consume (headroom for compiler-internal scratch).
_VMEM_BUDGET = max(_VMEM_LIMIT - (6 << 20), 8 << 20)

# MXU-aligned row granularity: multiple of 256 (v6e/v7x MXU is 2x256^2; also a multiple of
# v5e's 128 and of the bf16 (16,128) packing).
_TILE_GRAN = 256


def _round_up(x: int, m: int) -> int:
    return ((x + m - 1) // m) * m


def _next_pow2(n: int) -> int:
    n = max(int(n), 1)
    return 1 << (n - 1).bit_length()


# ----------------------------------------------------------------------------------------------
# Fused MLP head kernel: [x @ W + b -> ReLU] * (L-1) -> x @ W + b
# Operands enter the MXU as bf16; accumulation is f32 via preferred_element_type.
# ----------------------------------------------------------------------------------------------
def _make_head_kernel(num_layers: int):
    def kernel(*refs):
        x_ref = refs[0]
        out_ref = refs[-1]
        h = x_ref[...]                                              # bf16 (tile, in_dim)
        for i in range(num_layers):
            w = refs[1 + 2 * i][...]                                # bf16 (d_in, d_out)
            b = refs[2 + 2 * i][...]                                # f32  (1, d_out)
            acc = jnp.dot(h, w, preferred_element_type=jnp.float32) + b
            if i < num_layers - 1:
                # ReLU on hidden layers only; cast back to bf16 so the next MXU pass takes bf16.
                acc = jnp.maximum(acc, 0.0).astype(jnp.bfloat16)
            h = acc
        out_ref[...] = h.astype(out_ref.dtype)

    return kernel


def _choose_tile(n_rows: int, in_dim: int, out_dim: int, layer_dims, cap: int) -> int:
    """MXU-aligned row tile that fits the per-generation VMEM budget.

    Accounting (per review): 2 bf16 x-buffers + 2 f32 out-buffers per row, plus the f32
    accumulator + bf16 hidden intermediate (~6 B/row per max hidden dim), plus the resident
    weights double-buffered (we do not rely on pipeline_mode support).
    """
    weight_bytes = 2 * sum(din * dout * 2 + dout * 4 for din, dout in layer_dims)
    inter_bytes = 6 * max(dout for _, dout in layer_dims)
    per_row = 2 * in_dim * 2 + 2 * out_dim * 4 + inter_bytes
    avail = max(_VMEM_BUDGET - weight_bytes, per_row * _TILE_GRAN)
    max_rows = max(_TILE_GRAN, (avail // per_row) // _TILE_GRAN * _TILE_GRAN)

    # Prefer >= 2 grid steps (v7x two-TensorCore sharding) only when each step keeps >= 256 rows;
    # otherwise a single tile covering all rows (no forced split on small N).
    if n_rows > _TILE_GRAN:
        want = _round_up(-(-n_rows // 2), _TILE_GRAN)
    else:
        want = _TILE_GRAN
    tile = max(_TILE_GRAN, min(int(cap), max_rows, want))
    return (tile // _TILE_GRAN) * _TILE_GRAN


@functools.lru_cache(maxsize=None)
def _build_head_fn(num_layers, n_rows, in_dim, out_dim_pad, tile, layer_dims, out_dim_raw):
    """Returns a jitted fn(qidx, cids, in_vecs, char_emb, *flat_params) -> (n_rows, out_dim_pad) f32.

    The embedding gather, question-vector add, bf16 cast and last-layer lane padding are fused
    into the same jit as the pallas_call, so the f32 activation stream is never materialized.
    """
    num_tiles = n_rows // tile

    in_specs = [pl.BlockSpec((tile, in_dim), lambda i: (i, 0))]
    for (din, dout) in layer_dims:
        in_specs.append(pl.BlockSpec((din, dout), lambda i: (0, 0)))    # weights: resident
        in_specs.append(pl.BlockSpec((1, dout), lambda i: (0, 0)))      # biases:  resident
    out_specs = pl.BlockSpec((tile, out_dim_pad), lambda i: (i, 0))

    call = pl.pallas_call(
        _make_head_kernel(num_layers),
        out_shape=jax.ShapeDtypeStruct((n_rows, out_dim_pad), jnp.float32),
        grid_spec=pltpu.PrefetchScalarGridSpec(
            num_scalar_prefetch=0,
            grid=(num_tiles,),
            in_specs=in_specs,
            out_specs=out_specs,
        ),
        compiler_params=pltpu.CompilerParams(
            dimension_semantics=("parallel",),          # row axis shardable across v7x's 2 TCs
            vmem_limit_bytes=int(_VMEM_LIMIT),
        ),
    )

    @jax.jit
    def fn(qidx, cids, in_vecs, char_emb, *flat_params):
        # Fused (by XLA) gather + add + bf16 cast; index streams are pre-padded so the result
        # already has the padded row count (no second padded copy of x).
        x = (jnp.take(in_vecs, qidx, axis=0)
             + jnp.take(char_emb, cids, axis=0)).astype(jnp.bfloat16)
        params = []
        for li in range(num_layers):
            w = flat_params[2 * li].astype(jnp.bfloat16)
            b = flat_params[2 * li + 1].reshape(1, -1).astype(jnp.float32)
            dout = layer_dims[li][1]
            if int(w.shape[1]) != dout:                 # last layer: pad lanes to a 128 multiple
                w = jnp.pad(w, ((0, 0), (0, dout - int(w.shape[1]))))
                b = jnp.pad(b, ((0, 0), (0, dout - int(b.shape[1]))))
            params += [w, b]
        return call(x, *params)

    return fn


def generator_head_reference(x, weights, biases):
    """Pure-JAX mirror of the fused kernel (bf16 operands, f32 accumulation)."""
    h = x.astype(jnp.bfloat16)
    n = len(weights)
    for i, (w, b) in enumerate(zip(weights, biases)):
        h = jnp.dot(h, w.astype(jnp.bfloat16), preferred_element_type=jnp.float32) + b.astype(jnp.float32)
        if i < n - 1:
            h = jnp.maximum(h, 0.0).astype(jnp.bfloat16)
    return h


# ----------------------------------------------------------------------------------------------
# QaGenerator.forward (teacher forcing)
# ----------------------------------------------------------------------------------------------
def qa_generator_forward(in_vecs, targets, params, *, space_char_idx, eow_index,
                         forcing=True, batch_tile=2048):
    """Returns List[List[(preds (1, num_chars, T), trg_word (1, T))]] (numpy), matching the
    torch module's output structure. All device work is one fused jit (gather + Pallas head)."""
    if not forcing:
        raise NotImplementedError("forcing=False needs TdtGenerator.generate (not provided).")

    char_emb = params["char_emb"]
    weights, biases = params["weights"], params["biases"]
    num_chars = int(weights[-1].shape[1])
    in_dim = int(char_emb.shape[1])

    # Host-side, data-dependent word segmentation (same loop structure as the torch code).
    word_meta = []          # (instance_idx, start_in_flat, length, trg_word list)
    flat_qidx, flat_cids = [], []
    for inst_idx, t in enumerate(targets):
        t_list = [int(c) for c in np.asarray(t).tolist()]
        trg_bounds = [i for i, c in enumerate(t_list) if c == space_char_idx]
        for b, bn in zip([0] + trg_bounds, trg_bounds + [len(t_list)]):
            w_s = b + 1 if b > 0 else 0
            chars = t_list[w_s:bn]
            in_word = [eow_index] + chars           # teacher-forcing input
            trg_word = chars + [eow_index]          # target word
            start = len(flat_cids)
            flat_cids.extend(in_word)
            flat_qidx.extend([inst_idx] * len(in_word))
            word_meta.append((inst_idx, start, len(in_word), trg_word))

    N = len(flat_cids)
    if N == 0:
        return [[] for _ in targets]

    out_dim_pad = _round_up(max(num_chars, 128), 128)   # lane-dense (multiple of 128) logits
    layer_dims = tuple(
        (int(w.shape[0]), int(w.shape[1]) if i < len(weights) - 1 else out_dim_pad)
        for i, w in enumerate(weights))

    tile = _choose_tile(N, in_dim, out_dim_pad, layer_dims, batch_tile)
    num_tiles = -(-N // tile)
    # Bucket the padded row count to a power-of-two number of tiles: O(log N) recompiles and an
    # even number of grid steps whenever there is more than one (v7x load balance).
    n_pad = tile * _next_pow2(num_tiles)

    # Pad the (host-side) index streams instead of padding x on device: the padded rows reuse
    # index 0 and are simply discarded after the kernel.
    pad = n_pad - N
    qidx = jnp.asarray(flat_qidx + [0] * pad, dtype=jnp.int32)
    cids = jnp.asarray(flat_cids + [0] * pad, dtype=jnp.int32)

    fn = _build_head_fn(len(weights), n_pad, in_dim, out_dim_pad, tile, layer_dims, num_chars)
    flat_params = [a for wb in zip(weights, biases) for a in wb]
    logits_dev = fn(qidx, cids, in_vecs, char_emb, *flat_params)

    # Single device->host copy; per-word slicing + permute(0, 2, 1) in numpy so we do not issue
    # O(num_words) tiny XLA slice/transpose dispatches.
    logits = np.asarray(jax.block_until_ready(logits_dev))[:N, :num_chars]

    batch_insts = [[] for _ in range(len(targets))]
    for inst_idx, start, length, trg_word in word_meta:
        preds = logits[start:start + length].reshape(1, length, num_chars)
        preds = np.transpose(preds, (0, 2, 1))                      # == preds.permute(0, 2, 1)
        trg = np.asarray(trg_word, dtype=np.int32).reshape(1, -1)
        batch_insts[inst_idx].append((preds, trg))
    return batch_insts


def init_params(key, vec_dim, hidden, num_chars):
    """Deterministic params for the modeled generator (embedding + 2-layer head)."""
    k_emb, k_w1, k_b1, k_w2, k_b2 = jax.random.split(key, 5)
    char_emb = jax.random.normal(k_emb, (num_chars, vec_dim), jnp.float32) * 0.1
    b1_bound = 1.0 / float(np.sqrt(vec_dim))
    b2_bound = 1.0 / float(np.sqrt(hidden))
    w1 = jax.random.uniform(k_w1, (vec_dim, hidden), jnp.float32, -b1_bound, b1_bound)
    b1 = jax.random.uniform(k_b1, (hidden,), jnp.float32, -b1_bound, b1_bound)
    w2 = jax.random.uniform(k_w2, (hidden, num_chars), jnp.float32, -b2_bound, b2_bound)
    b2 = jax.random.uniform(k_b2, (num_chars,), jnp.float32, -b2_bound, b2_bound)
    return {"char_emb": char_emb, "weights": [w1, w2], "biases": [b1, b2]}


if __name__ == "__main__":
    vec_dim = 256          # question-vector dimension
    hidden = 256           # generator hidden size
    num_chars = 100        # character vocabulary (eow=0, space=1, letters >= 2)
    space_char_idx = 1
    eow_index = 0
    batch = 2

    key = jax.random.PRNGKey(0)
    key, kv = jax.random.split(key)
    in_vecs = jax.random.normal(kv, (batch, vec_dim), jnp.float32)

    # Deterministic targets: char-id sequences with spaces separating "words".
    targets = [
        jnp.array([5, 7, 9, 1, 12, 14, 1, 23, 24, 25, 26], dtype=jnp.int32),
        jnp.array([30, 31, 1, 40, 41, 42, 43, 1, 50], dtype=jnp.int32),
    ]

    params = init_params(key, vec_dim, hidden, num_chars)

    out = qa_generator_forward(in_vecs, targets, params,
                               space_char_idx=space_char_idx, eow_index=eow_index,
                               forcing=True)

    # Pure-JAX per-word reference check of the whole forward pass.
    ok = True
    for inst_idx, (v, t) in enumerate(zip(in_vecs, targets)):
        t_list = [int(c) for c in np.asarray(t).tolist()]
        trg_bounds = [i for i, c in enumerate(t_list) if c == space_char_idx]
        for w_i, (b, bn) in enumerate(zip([0] + trg_bounds, trg_bounds + [len(t_list)])):
            w_s = b + 1 if b > 0 else 0
            chars = t_list[w_s:bn]
            in_word = jnp.asarray([eow_index] + chars, dtype=jnp.int32)
            x_word = v[None, :] + jnp.take(params["char_emb"], in_word, axis=0)
            ref = generator_head_reference(x_word, params["weights"], params["biases"])
            ref = np.transpose(np.asarray(ref)[None, :, :], (0, 2, 1))   # (1, num_chars, T)
            preds, trg = out[inst_idx][w_i]
            assert preds.shape == ref.shape, (preds.shape, ref.shape)
            assert trg.shape == (1, len(chars) + 1)
            if not np.allclose(preds, ref, atol=1e-2, rtol=1e-2):
                ok = False
    assert ok, "Pallas QaGenerator output mismatch vs pure-JAX reference"

    print("KERNEL_OK")
</pallas_src>

<mosaic_0001>
module attributes {stable_mosaic.version = 11 : i64} {
  func.func @kernel(%arg0: i32, %arg1: memref<256x256xbf16, #tpu.memory_space<vmem>>, %arg2: memref<256x256xbf16, #tpu.memory_space<vmem>>, %arg3: memref<1x256xf32, #tpu.memory_space<vmem>>, %arg4: memref<256x128xbf16, #tpu.memory_space<vmem>>, %arg5: memref<1x128xf32, #tpu.memory_space<vmem>>, %arg6: memref<256x128xf32, #tpu.memory_space<vmem>>) attributes {dimension_semantics = [#tpu.dimension_semantics<parallel>], iteration_bounds = array<i64: 1>, scalar_prefetch = 0 : i64, scratch_operands = 0 : i64, tpu.core_type = #tpu.core_type<tc>, window_params = [{transform_indices = @transform_0, window_bounds = array<i64: 256, 256>}, {pipeline_mode = #tpu.pipeline_mode<synchronous>, transform_indices = @transform_1, window_bounds = array<i64: 256, 256>}, {pipeline_mode = #tpu.pipeline_mode<synchronous>, transform_indices = @transform_2, window_bounds = array<i64: 1, 256>}, {pipeline_mode = #tpu.pipeline_mode<synchronous>, transform_indices = @transform_3, window_bounds = array<i64: 256, 128>}, {pipeline_mode = #tpu.pipeline_mode<synchronous>, transform_indices = @transform_4, window_bounds = array<i64: 1, 128>}, {transform_indices = @transform_5, window_bounds = array<i64: 256, 128>}]} {
    %c0 = arith.constant 0 : index
    %c0_0 = arith.constant 0 : index
    %0 = vector.load %arg1[%c0, %c0_0] : memref<256x256xbf16, #tpu.memory_space<vmem>>, vector<256x256xbf16>
    %c0_1 = arith.constant 0 : index
    %c0_2 = arith.constant 0 : index
    %1 = vector.load %arg2[%c0_1, %c0_2] : memref<256x256xbf16, #tpu.memory_space<vmem>>, vector<256x256xbf16>
    %c0_3 = arith.constant 0 : index
    %c0_4 = arith.constant 0 : index
    %2 = vector.load %arg3[%c0_3, %c0_4] : memref<1x256xf32, #tpu.memory_space<vmem>>, vector<1x256xf32>
    %cst = arith.constant dense<0.000000e+00> : vector<256x256xf32>
    %3 = tpu.matmul %0, %1, %cst {dimension_numbers = #tpu.dot_dimension_numbers<[1], [0], [0], [1], [0, 0, 1, 1], [], []>} : vector<256x256xbf16>, vector<256x256xbf16>, vector<256x256xf32> -> vector<256x256xf32>
    %4 = vector.broadcast %2 : vector<1x256xf32> to vector<256x256xf32>
    %5 = arith.addf %3, %4 : vector<256x256xf32>
    %cst_5 = arith.constant 0.000000e+00 : f32
    %6 = vector.broadcast %cst_5 : f32 to vector<256x256xf32>
    %7 = arith.maximumf %5, %6 : vector<256x256xf32>
    %8 = arith.truncf %7 : vector<256x256xf32> to vector<256x256xbf16>
    %c0_6 = arith.constant 0 : index
    %c0_7 = arith.constant 0 : index
    %9 = vector.load %arg4[%c0_6, %c0_7] : memref<256x128xbf16, #tpu.memory_space<vmem>>, vector<256x128xbf16>
    %c0_8 = arith.constant 0 : index
    %c0_9 = arith.constant 0 : index
    %10 = vector.load %arg5[%c0_8, %c0_9] : memref<1x128xf32, #tpu.memory_space<vmem>>, vector<1x128xf32>
    %cst_10 = arith.constant dense<0.000000e+00> : vector<256x128xf32>
    %11 = tpu.matmul %8, %9, %cst_10 {dimension_numbers = #tpu.dot_dimension_numbers<[1], [0], [0], [1], [0, 0, 1, 1], [], []>} : vector<256x256xbf16>, vector<256x128xbf16>, vector<256x128xf32> -> vector<256x128xf32>
    %12 = vector.broadcast %10 : vector<1x128xf32> to vector<256x128xf32>
    %13 = arith.addf %11, %12 : vector<256x128xf32>
    %c0_11 = arith.constant 0 : index
    %c0_12 = arith.constant 0 : index
    %14 = vector.load %arg6[%c0_11, %c0_12] : memref<256x128xf32, #tpu.memory_space<vmem>>, vector<256x128xf32>
    tpu.vector_store %arg6[%c0_11, %c0_12], %13 {strides = array<i32>} : memref<256x128xf32, #tpu.memory_space<vmem>>, vector<256x128xf32>,
    return
  }
  func.func @transform_0(%arg0: i32) -> (i32, i32) {
    %c0_i32 = arith.constant 0 : i32
    %c0_i32_0 = arith.constant 0 : i32
    return %arg0, %c0_i32 : i32, i32
  }
  func.func @transform_1(%arg0: i32) -> (i32, i32) {
    %c0_i32 = arith.constant 0 : i32
    %c0_i32_0 = arith.constant 0 : i32
    %c0_i32_1 = arith.constant 0 : i32
    return %c0_i32, %c0_i32_0 : i32, i32
  }
  func.func @transform_2(%arg0: i32) -> (i32, i32) {
    %c0_i32 = arith.constant 0 : i32
    %c0_i32_0 = arith.constant 0 : i32
    %c0_i32_1 = arith.constant 0 : i32
    return %c0_i32, %c0_i32_0 : i32, i32
  }
  func.func @transform_3(%arg0: i32) -> (i32, i32) {
    %c0_i32 = arith.constant 0 : i32
    %c0_i32_0 = arith.constant 0 : i32
    %c0_i32_1 = arith.constant 0 : i32
    return %c0_i32, %c0_i32_0 : i32, i32
  }
  func.func @transform_4(%arg0: i32) -> (i32, i32) {
    %c0_i32 = arith.constant 0 : i32
    %c0_i32_0 = arith.constant 0 : i32
    %c0_i32_1 = arith.constant 0 : i32
    return %c0_i32, %c0_i32_0 : i32, i32
  }
  func.func @transform_5(%arg0: i32) -> (i32, i32) {
    %c0_i32 = arith.constant 0 : i32
    %c0_i32_0 = arith.constant 0 : i32
    return %arg0, %c0_i32 : i32, i32
  }
}

</mosaic_0001>

<bundles_post_ra>
// kernel: fn.1
= control target key start
LH: loop header
LB: loop body
LE: loop exit
PB: predicated region body
PF: predicated region fallthrough
CT: control target
= control target key end

     0   :  { %s1776_s0 = inlined_call_operand.vmem [shape: bf16[256,256], index: 0, kind: input, shape index: {}]   ;;  %s1777_s1 = inlined_call_operand.vmem [shape: bf16[256,256], index: 1, kind: input, shape index: {}]   ;;  %s1778_s2 = inlined_call_operand.vmem [shape: f32[1,256], index: 2, kind: input, shape index: {}]   ;;  %s1779_s3 = inlined_call_operand.vmem [shape: bf16[256,128], index: 3, kind: input, shape index: {}]   ;;  %s1780_s4 = inlined_call_operand.vmem [shape: f32[1,128], index: 4, kind: input, shape index: {}]   ;;  %s1781_s5 = inlined_call_operand.hbm [shape: f32[256,128], index: 5, kind: output, shape index: {}]  }
   0x1   :  { %v1247_v0 = vld [vmem:[%s1777_s1 + $0x4] ss:$8 sps:$4 sm:$0xff]   ;;  %v1249_v1 = vld [vmem:[%s1777_s1] ss:$8 sps:$4 sm:$0xff]   ;;  %v1250_v2 = vld [vmem:[%s1777_s1 + $0x14] ss:$8 sps:$4 sm:$0xff]  }
   0x2   :  { %418 = vmatprep.subr.bf16.mxu0 %v1247_v0  ;;  %v1252_v3 = vld [vmem:[%s1777_s1 + $0x10] ss:$8 sps:$4 sm:$0xff]   ;;  %v1253_v4 = vld [vmem:[%s1777_s1 + $0x24] ss:$8 sps:$4 sm:$0xff]   ;;  %v1255_v5 = vld [vmem:[%s1777_s1 + $0x20] ss:$8 sps:$4 sm:$0xff]  }
   0x3   :  { %419 = vmatpush1.bf16.msra.mxu0 %v1249_v1  ;;  %v1256_v6 = vld [vmem:[%s1777_s1 + $0x34] ss:$8 sps:$4 sm:$0xff]   ;;  %v1258_v7 = vld [vmem:[%s1777_s1 + $0x30] ss:$8 sps:$4 sm:$0xff]   ;;  %v1259_v8 = vld [vmem:[%s1777_s1 + $0x44] ss:$8 sps:$4 sm:$0xff]  }
   0x4   :  { %420 = vmatprep.subr.bf16.mxu0 %v1250_v2  ;;  %v1261_v9 = vld [vmem:[%s1777_s1 + $0x40] ss:$8 sps:$4 sm:$0xff]   ;;  %v1262_v10 = vld [vmem:[%s1777_s1 + $0x54] ss:$8 sps:$4 sm:$0xff]   ;;  %v1264_v11 = vld [vmem:[%s1777_s1 + $0x50] ss:$8 sps:$4 sm:$0xff]  }
   0x5   :  { %v1265_v12 = vld [vmem:[%s1777_s1 + $0x64] ss:$8 sps:$4 sm:$0xff]   ;;  %v1267_v14 = vld [vmem:[%s1777_s1 + $0x60] ss:$8 sps:$4 sm:$0xff]   ;;  %v1268_v15 = vld [vmem:[%s1777_s1 + $0x74] ss:$8 sps:$4 sm:$0xff]  }
   0x6   :  { %v1297_v13 = vld [vmem:[%s1776_s0 + $0x4] ss:$8 sps:$4 sm:$0xff]   ;;  %v1270_v16 = vld [vmem:[%s1777_s1 + $0x70] ss:$8 sps:$4 sm:$0xff]   ;;  %v1273_v18 = vld [vmem:[%s1777_s1 + $0x80] ss:$8 sps:$4 sm:$0xff]  }
   0x7   :  { %421 = vmatpush1.bf16.msra.mxu0 %v1252_v3  ;;  %450 = vmatprep.mubr.bf16.mxu0 %v1297_v13  ;;  %v1271_v17 = vld [vmem:[%s1777_s1 + $0x84] ss:$8 sps:$4 sm:$0xff]   ;;  %v1274_v19 = vld [vmem:[%s1777_s1 + $0x94] ss:$8 sps:$4 sm:$0xff]   ;;  %v1276_v20 = vld [vmem:[%s1777_s1 + $0x90] ss:$8 sps:$4 sm:$0xff]  }
   0x8   :  { %422 = vmatprep.subr.bf16.mxu0 %v1253_v4  ;;  %v1277_v21 = vld [vmem:[%s1777_s1 + $0xa4] ss:$8 sps:$4 sm:$0xff]   ;;  %v1279_v22 = vld [vmem:[%s1777_s1 + $0xa0] ss:$8 sps:$4 sm:$0xff]   ;;  %v1280_v23 = vld [vmem:[%s1777_s1 + $0xb4] ss:$8 sps:$4 sm:$0xff]  }
   0x9   :  { %v1282_v24 = vld [vmem:[%s1777_s1 + $0xb0] ss:$8 sps:$4 sm:$0xff]   ;;  %v1283_v25 = vld [vmem:[%s1777_s1 + $0xc4] ss:$8 sps:$4 sm:$0xff]   ;;  %v1285_v26 = vld [vmem:[%s1777_s1 + $0xc0] ss:$8 sps:$4 sm:$0xff]  }
   0xa   :  { %v1286_v27 = vld [vmem:[%s1777_s1 + $0xd4] ss:$8 sps:$4 sm:$0xff]   ;;  %v1288_v28 = vld [vmem:[%s1777_s1 + $0xd0] ss:$8 sps:$4 sm:$0xff]   ;;  %v1289_v29 = vld [vmem:[%s1777_s1 + $0xe4] ss:$8 sps:$4 sm:$0xff]  }
   0xb   :  { %423 = vmatpush1.bf16.msra.mxu0 %v1255_v5 }
   0xc   :  { %424 = vmatprep.subr.bf16.mxu0 %v1256_v6 }
   0xf   :  { %425 = vmatpush1.bf16.msra.mxu0 %v1258_v7 }
  0x10   :  { %426 = vmatprep.subr.bf16.mxu0 %v1259_v8 }
  0x13   :  { %427 = vmatpush1.bf16.msra.mxu0 %v1261_v9 }
  0x14   :  { %428 = vmatprep.subr.bf16.mxu0 %v1262_v10 }
  0x17   :  { %429 = vmatpush1.bf16.msra.mxu0 %v1264_v11 }
  0x18   :  { %430 = vmatprep.subr.bf16.mxu0 %v1265_v12 }
  0x1b   :  { %431 = vmatpush1.bf16.msra.mxu0 %v1267_v14 }
  0x1c   :  { %432 = vmatprep.subr.bf16.mxu0 %v1268_v15 }
  0x1f   :  { %433 = vmatpush1.bf16.msra.mxu0 %v1270_v16 }
  0x20   :  { %434 = vmatprep.subr.bf16.mxu0 %v1271_v17 }
  0x23   :  { %435 = vmatpush1.bf16.msra.mxu0 %v1273_v18 }
  0x24   :  { %436 = vmatprep.subr.bf16.mxu0 %v1274_v19 }
  0x27   :  { %437 = vmatpush1.bf16.msra.mxu0 %v1276_v20 }
  0x28   :  { %438 = vmatprep.subr.bf16.mxu0 %v1277_v21 }
  0x2b   :  { %439 = vmatpush1.bf16.msra.mxu0 %v1279_v22 }
  0x2c   :  { %440 = vmatprep.subr.bf16.mxu0 %v1280_v23 }
  0x2f   :  { %441 = vmatpush1.bf16.msra.mxu0 %v1282_v24 }
  0x30   :  { %442 = vmatprep.subr.bf16.mxu0 %v1283_v25 }
  0x33   :  { %443 = vmatpush1.bf16.msra.mxu0 %v1285_v26 }
  0x34   :  { %444 = vmatprep.subr.bf16.mxu0 %v1286_v27 }
  0x35   :  { %10 = vsyncpa [#allocation3], 0  ;;  %v1291_v30 = vld [vmem:[%s1777_s1 + $0xe0] ss:$8 sps:$4 sm:$0xff]   ;;  %v1292_v31 = vld [vmem:[%s1777_s1 + $0xf4] ss:$8 sps:$4 sm:$0xff]   ;;  %v88_v16 = vlaneseq }
  0x36   :  { %v1343_v32 = vld [vmem:[%s1779_s3 + $0x40] sm:$0xff]   ;;  %v1345_v34 = vld [vmem:[%s1779_s3 + $0x48] sm:$0xff]   ;;  %v1294_v35 = vld [vmem:[%s1777_s1 + $0xf0] ss:$8 sps:$4 sm:$0xff]  }
  0x37   :  { %445 = vmatpush1.bf16.msra.mxu0 %v1288_v28  ;;  %v1344_v33 = vld [vmem:[%s1779_s3] sm:$0xff]   ;;  %1132 = vmatprep.subr.bf16.mxu1 %v1343_v32  ;;  %v1346_v36 = vld [vmem:[%s1779_s3 + $0x8] sm:$0xff]   ;;  %v1347_v38 = vld [vmem:[%s1779_s3 + $0x50] sm:$0xff]   ;;  %v89_v17 = vshrl.u32 %v88_v16, 7 }
  0x38   :  { %446 = vmatprep.subr.bf16.mxu0 %v1289_v29  ;;  %1133 = vmatpush3.bf16.msra.mxu1 %v1344_v33  ;;  %v1295_v37 = vld [vmem:[%s1776_s0] ss:$8 sps:$4 sm:$0xff]   ;;  %v1298_v39 = vld [vmem:[%s1776_s0 + $0x14] ss:$8 sps:$4 sm:$0xff]   ;;  %v1300_v43 = vld [vmem:[%s1776_s0 + $0x10] ss:$8 sps:$4 sm:$0xff]  }
  0x39   :  { %1134 = vmatprep.subr.bf16.mxu1 %v1345_v34  ;;  %v1348_v40 = vld [vmem:[%s1779_s3 + $0x10] sm:$0xff]   ;;  %v1349_v41 = vld [vmem:[%s1779_s3 + $0x58] sm:$0xff]   ;;  %v1351_v44 = vld [vmem:[%s1779_s3 + $0x60] sm:$0xff]   ;;  %v90_v18 = vsub.s32 0, %v89_v17  ;;  %v94_v20 = vsub.s32 1, %v89_v17 }
  0x3a   :  { %v1350_v42 = vld [vmem:[%s1779_s3 + $0x18] sm:$0xff]   ;;  %v1301_v45 = vld [vmem:[%s1776_s0 + $0x24] ss:$8 sps:$4 sm:$0xff]   ;;  %v1303_v48 = vld [vmem:[%s1776_s0 + $0x20] ss:$8 sps:$4 sm:$0xff]  }
  0x3b   :  { %447 = vmatpush1.bf16.msra.mxu0 %v1291_v30  ;;  %v1352_v46 = vld [vmem:[%s1779_s3 + $0x20] sm:$0xff]   ;;  %v1353_v47 = vld [vmem:[%s1779_s3 + $0x68] sm:$0xff]   ;;  %v1304_v49 = vld [vmem:[%s1776_s0 + $0x34] ss:$8 sps:$4 sm:$0xff]  }
  0x3c   :  { %448 = vmatprep.subr.bf16.mxu0 %v1292_v31  ;;  %1135 = vmatpush3.bf16.msra.mxu1 %v1346_v36  ;;  %v1306_v50 = vld [vmem:[%s1776_s0 + $0x30] ss:$8 sps:$4 sm:$0xff]   ;;  %v1307_v51 = vld [vmem:[%s1776_s0 + $0x44] ss:$8 sps:$4 sm:$0xff]   ;;  %v1309_v52 = vld [vmem:[%s1776_s0 + $0x40] ss:$8 sps:$4 sm:$0xff]  }
  0x3d   :  { %1136 = vmatprep.subr.bf16.mxu1 %v1347_v38  ;;  %v1310_v53 = vld [vmem:[%s1776_s0 + $0x54] ss:$8 sps:$4 sm:$0xff]   ;;  %v1312_v54 = vld [vmem:[%s1776_s0 + $0x50] ss:$8 sps:$4 sm:$0xff]   ;;  %v1313_v55 = vld [vmem:[%s1776_s0 + $0x64] ss:$8 sps:$4 sm:$0xff]  }
  0x3e   :  { %v1315_v56 = vld [vmem:[%s1776_s0 + $0x60] ss:$8 sps:$4 sm:$0xff]   ;;  %v1316_v57 = vld [vmem:[%s1776_s0 + $0x74] ss:$8 sps:$4 sm:$0xff]   ;;  %v1318_v58 = vld [vmem:[%s1776_s0 + $0x70] ss:$8 sps:$4 sm:$0xff]  }
  0x3f   :  { %449 = vmatpush1.bf16.msra.mxu0 %v1294_v35  ;;  %v1319_v59 = vld [vmem:[%s1776_s0 + $0x84] ss:$8 sps:$4 sm:$0xff]   ;;  %v1321_v60 = vld [vmem:[%s1776_s0 + $0x80] ss:$8 sps:$4 sm:$0xff]   ;;  %v1322_v61 = vld [vmem:[%s1776_s0 + $0x94] ss:$8 sps:$4 sm:$0xff]  }
  0x40   :  { %1137 = vmatpush3.bf16.msra.mxu1 %v1348_v40  ;;  %v1324_v62 = vld [vmem:[%s1776_s0 + $0x90] ss:$8 sps:$4 sm:$0xff]   ;;  %v1325_v63 = vld [vmem:[%s1776_s0 + $0xa4] ss:$8 sps:$4 sm:$0xff]   ;;  %v1327_v0 = vld [vmem:[%s1776_s0 + $0xa0] ss:$8 sps:$4 sm:$0xff]  }
  0x41   :  { %1138 = vmatprep.subr.bf16.mxu1 %v1349_v41  ;;  %v1328_v1 = vld [vmem:[%s1776_s0 + $0xb4] ss:$8 sps:$4 sm:$0xff]   ;;  %v1354_v2 = vld [vmem:[%s1779_s3 + $0x28] sm:$0xff]   ;;  %v1330_v3 = vld [vmem:[%s1776_s0 + $0xb0] ss:$8 sps:$4 sm:$0xff]  }
  0x42   :  { %451 = vmatmul.mubr.bf16.vlgmr.msra.gmra.mrb[0].mxu0 %v1295_v37  ;;  %v1355_v4 = vld [vmem:[%s1779_s3 + $0x70] sm:$0xff]   ;;  %v1331_v5 = vld [vmem:[%s1776_s0 + $0xc4] ss:$8 sps:$4 sm:$0xff]   ;;  %v1357_v7 = vld [vmem:[%s1779_s3 + $0x78] sm:$0xff]  }
  0x43   :  { %460 = vmatprep.mubr.bf16.mxu0 %v1298_v39  ;;  %v1356_v6 = vld [vmem:[%s1779_s3 + $0x30] sm:$0xff]   ;;  %v1358_v8 = vld [vmem:[%s1779_s3 + $0x38] sm:$0xff]   ;;  %v1333_v9 = vld [vmem:[%s1776_s0 + $0xc0] ss:$8 sps:$4 sm:$0xff]  }
  0x44   :  { %1139 = vmatpush3.bf16.msra.mxu1 %v1350_v42  ;;  %v1334_v10 = vld [vmem:[%s1776_s0 + $0xd4] ss:$8 sps:$4 sm:$0xff]   ;;  %v1336_v11 = vld [vmem:[%s1776_s0 + $0xd0] ss:$8 sps:$4 sm:$0xff]   ;;  %v1337_v12 = vld [vmem:[%s1776_s0 + $0xe4] ss:$8 sps:$4 sm:$0xff]  }
  0x45   :  { %1140 = vmatprep.subr.bf16.mxu1 %v1351_v44  ;;  %v1339_v13 = vld [vmem:[%s1776_s0 + $0xe0] ss:$8 sps:$4 sm:$0xff]   ;;  %v1340_v14 = vld [vmem:[%s1776_s0 + $0xf4] ss:$8 sps:$4 sm:$0xff]   ;;  %v1342_v15 = vld [vmem:[%s1776_s0 + $0xf0] ss:$8 sps:$4 sm:$0xff]  }
  0x46   :  { %v86_v19 = vld [vmem:[%s1778_s2] sm:$0x3] }
  0x47   :  { %v1659_v21 = vrot.slane %v86_v19, %v90_v18  ;;  %v1661_v22 = vrot.slane %v86_v19, %v94_v20 }
  0x48   :  { %1141 = vmatpush3.bf16.msra.mxu1 %v1352_v46 }
  0x49   :  { %1142 = vmatprep.subr.bf16.mxu1 %v1353_v47 }
  0x4a   :  { %461 = vmatmul.mubr.bf16.gmra.mrb[4].mxu0 %v1300_v43 }
  0x4b   :  { %470 = vmatprep.mubr.bf16.mxu0 %v1301_v45 }
  0x4c   :  { %1143 = vmatpush3.bf16.msra.mxu1 %v1354_v2 }
  0x4d   :  { %1144 = vmatprep.subr.bf16.mxu1 %v1355_v4 }
  0x50   :  { %1145 = vmatpush3.bf16.msra.mxu1 %v1356_v6 }
  0x51   :  { %1146 = vmatprep.subr.bf16.mxu1 %v1357_v7 }
  0x52   :  { %471 = vmatmul.mubr.bf16.gmra.mrb[8].mxu0 %v1303_v48 }
  0x53   :  { %480 = vmatprep.mubr.bf16.mxu0 %v1304_v49 }
  0x54   :  { %1147 = vmatpush3.bf16.msra.mxu1 %v1358_v8 }
  0x5a   :  { %481 = vmatmul.mubr.bf16.gmra.mrb[12].mxu0 %v1306_v50 }
  0x5b   :  { %490 = vmatprep.mubr.bf16.mxu0 %v1307_v51 }
  0x62   :  { %491 = vmatmul.mubr.bf16.gmra.mrb[16].mxu0 %v1309_v52 }
  0x63   :  { %500 = vmatprep.mubr.bf16.mxu0 %v1310_v53 }
  0x6a   :  { %501 = vmatmul.mubr.bf16.gmra.mrb[20].mxu0 %v1312_v54 }
  0x6b   :  { %510 = vmatprep.mubr.bf16.mxu0 %v1313_v55 }
  0x72   :  { %511 = vmatmul.mubr.bf16.gmra.mrb[24].mxu0 %v1315_v56 }
  0x73   :  { %520 = vmatprep.mubr.bf16.mxu0 %v1316_v57 }
  0x7a   :  { %521 = vmatmul.mubr.bf16.gmra.mrb[28].mxu0 %v1318_v58 }
  0x7b   :  { %530 = vmatprep.mubr.bf16.mxu0 %v1319_v59 }
  0x82   :  { %531 = vmatmul.mubr.bf16.gmra.mrb[32].mxu0 %v1321_v60 }
  0x83   :  { %540 = vmatprep.mubr.bf16.mxu0 %v1322_v61 }
  0x8a   :  { %541 = vmatmul.mubr.bf16.gmra.mrb[36].mxu0 %v1324_v62 }
  0x8b   :  { %550 = vmatprep.mubr.bf16.mxu0 %v1325_v63 }
  0x92   :  { %551 = vmatmul.mubr.bf16.gmra.mrb[40].mxu0 %v1327_v0 }
  0x93   :  { %560 = vmatprep.mubr.bf16.mxu0 %v1328_v1 }
  0x9a   :  { %561 = vmatmul.mubr.bf16.gmra.mrb[44].mxu0 %v1330_v3 }
  0x9b   :  { %570 = vmatprep.mubr.bf16.mxu0 %v1331_v5 }
  0xa2   :  { %571 = vmatmul.mubr.bf16.gmra.mrb[48].mxu0 %v1333_v9 }
  0xa3   :  { %580 = vmatprep.mubr.bf16.mxu0 %v1334_v10 }
  0xaa   :  { %581 = vmatmul.mubr.bf16.gmra.mrb[52].mxu0 %v1336_v11 }
  0xab   :  { %590 = vmatprep.mubr.bf16.mxu0 %v1337_v12 }
  0xb2   :  { %591 = vmatmul.mubr.bf16.gmra.mrb[56].mxu0 %v1339_v13 }
  0xb3   :  { %600 = vmatprep.mubr.bf16.mxu0 %v1340_v14 }
  0xba   :  { %601 = vmatmul.mubr.bf16.gmra.mrb[60].mxu0 %v1342_v15 }
 0x115   :  { %v452_v23 = vpop.f32.mrb[0].mxu0 }
 0x116   :  { %v453_v24 = vadd.f32 %v452_v23, %v1659_v21  ;;  %v454_v25 = vpop.f32.mrb[1].mxu0 }
 0x117   :  { %v455_v26 = vadd.f32 %v454_v25, %v1661_v22  ;;  %v456_v27 = vpop.f32.mrb[2].mxu0 }
 0x118   :  { %v457_v28 = vadd.f32 %v456_v27, %v1659_v21  ;;  %v458_v29 = vpop.f32.mrb[3].mxu0  ;;  %v611_v31 = vmax.f32 %v453_v24, 0.0 }
 0x119   :  { %v459_v30 = vadd.f32 %v458_v29, %v1661_v22  ;;  %v612_v33 = vmax.f32 %v455_v26, 0.0 }
 0x11a   :  { %v613_v32 = vmax.f32 %v457_v28, 0.0 }
 0x11b   :  { %v614_v34 = vmax.f32 %v459_v30, 0.0 }
 0x11c   :  { %v675_v35 = vpack.c.bf16 %v613_v32, %v611_v31 }
 0x11d   :  { %v462_v36 = vpop.f32.mrb[4].mxu0  ;;  %v676_v37 = vpack.c.bf16 %v614_v34, %v612_v33 }
 0x11e   :  { %v463_v38 = vadd.f32 %v462_v36, %v1659_v21  ;;  %v464_v39 = vpop.f32.mrb[5].mxu0 }
 0x11f   :  { %v465_v40 = vadd.f32 %v464_v39, %v1661_v22  ;;  %v466_v41 = vpop.f32.mrb[6].mxu0  ;;  %874 = vmatprep.mubr.bf16.mxu1 %v676_v37 }
 0x120   :  { %v467_v42 = vadd.f32 %v466_v41, %v1659_v21  ;;  %v468_v43 = vpop.f32.mrb[7].mxu0  ;;  %875 = vmatmul.mubr.bf16.vlgmr.msra.gmra.mrb[0].mxu1 %v675_v35  ;;  %v615_v45 = vmax.f32 %v463_v38, 0.0 }
 0x121   :  { %v469_v44 = vadd.f32 %v468_v43, %v1661_v22  ;;  %v616_v47 = vmax.f32 %v465_v40, 0.0 }
 0x122   :  { %v617_v46 = vmax.f32 %v467_v42, 0.0 }
 0x123   :  { %v618_v48 = vmax.f32 %v469_v44, 0.0 }
 0x124   :  { %v677_v49 = vpack.c.bf16 %v617_v46, %v615_v45 }
 0x125   :  { %v678_v50 = vpack.c.bf16 %v618_v48, %v616_v47  ;;  %v472_v51 = vpop.f32.mrb[8].mxu0 }
 0x126   :  { %v473_v52 = vadd.f32 %v472_v51, %v1659_v21  ;;  %v474_v53 = vpop.f32.mrb[9].mxu0 }
 0x127   :  { %v475_v54 = vadd.f32 %v474_v53, %v1661_v22  ;;  %v476_v55 = vpop.f32.mrb[10].mxu0  ;;  %882 = vmatprep.mubr.bf16.mxu1 %v678_v50 }
 0x128   :  { %v477_v56 = vadd.f32 %v476_v55, %v1659_v21  ;;  %v478_v57 = vpop.f32.mrb[11].mxu0  ;;  %883 = vmatmul.mubr.bf16.gmra.mrb[4].mxu1 %v677_v49  ;;  %v619_v59 = vmax.f32 %v473_v52, 0.0 }
 0x129   :  { %v479_v58 = vadd.f32 %v478_v57, %v1661_v22  ;;  %v620_v61 = vmax.f32 %v475_v54, 0.0 }
 0x12a   :  { %v621_v60 = vmax.f32 %v477_v56, 0.0 }
 0x12b   :  { %v622_v62 = vmax.f32 %v479_v58, 0.0 }
 0x12c   :  { %v679_v63 = vpack.c.bf16 %v621_v60, %v619_v59 }
 0x12d   :  { %v680_v0 = vpack.c.bf16 %v622_v62, %v620_v61  ;;  %v482_v1 = vpop.f32.mrb[12].mxu0 }
 0x12e   :  { %v483_v2 = vadd.f32 %v482_v1, %v1659_v21  ;;  %v484_v3 = vpop.f32.mrb[13].mxu0 }
 0x12f   :  { %v485_v4 = vadd.f32 %v484_v3, %v1661_v22  ;;  %v486_v5 = vpop.f32.mrb[14].mxu0  ;;  %890 = vmatprep.mubr.bf16.mxu1 %v680_v0 }
 0x130   :  { %v487_v6 = vadd.f32 %v486_v5, %v1659_v21  ;;  %v488_v7 = vpop.f32.mrb[15].mxu0  ;;  %891 = vmatmul.mubr.bf16.gmra.mrb[8].mxu1 %v679_v63  ;;  %v623_v9 = vmax.f32 %v483_v2, 0.0 }
 0x131   :  { %v489_v8 = vadd.f32 %v488_v7, %v1661_v22  ;;  %v624_v11 = vmax.f32 %v485_v4, 0.0 }
 0x132   :  { %v625_v10 = vmax.f32 %v487_v6, 0.0 }
 0x133   :  { %v626_v12 = vmax.f32 %v489_v8, 0.0 }
 0x134   :  { %v681_v13 = vpack.c.bf16 %v625_v10, %v623_v9 }
 0x135   :  { %v682_v14 = vpack.c.bf16 %v626_v12, %v624_v11  ;;  %v492_v15 = vpop.f32.mrb[16].mxu0 }
 0x136   :  { %v493_v16 = vadd.f32 %v492_v15, %v1659_v21  ;;  %v494_v17 = vpop.f32.mrb[17].mxu0 }
 0x137   :  { %v495_v18 = vadd.f32 %v494_v17, %v1661_v22  ;;  %v496_v19 = vpop.f32.mrb[18].mxu0  ;;  %898 = vmatprep.mubr.bf16.mxu1 %v682_v14 }
 0x138   :  { %v497_v20 = vadd.f32 %v496_v19, %v1659_v21  ;;  %v498_v23 = vpop.f32.mrb[19].mxu0  ;;  %899 = vmatmul.mubr.bf16.gmra.mrb[12].mxu1 %v681_v13  ;;  %v627_v25 = vmax.f32 %v493_v16, 0.0 }
 0x139   :  { %v499_v24 = vadd.f32 %v498_v23, %v1661_v22  ;;  %v628_v27 = vmax.f32 %v495_v18, 0.0 }
 0x13a   :  { %v629_v26 = vmax.f32 %v497_v20, 0.0 }
 0x13b   :  { %v630_v28 = vmax.f32 %v499_v24, 0.0 }
 0x13c   :  { %v683_v29 = vpack.c.bf16 %v629_v26, %v627_v25 }
 0x13d   :  { %v684_v30 = vpack.c.bf16 %v630_v28, %v628_v27  ;;  %v502_v31 = vpop.f32.mrb[20].mxu0 }
 0x13e   :  { %v503_v32 = vadd.f32 %v502_v31, %v1659_v21  ;;  %v504_v33 = vpop.f32.mrb[21].mxu0 }
 0x13f   :  { %v505_v34 = vadd.f32 %v504_v33, %v1661_v22  ;;  %v506_v35 = vpop.f32.mrb[22].mxu0  ;;  %906 = vmatprep.mubr.bf16.mxu1 %v684_v30 }
 0x140   :  { %v507_v36 = vadd.f32 %v506_v35, %v1659_v21  ;;  %v508_v37 = vpop.f32.mrb[23].mxu0  ;;  %907 = vmatmul.mubr.bf16.gmra.mrb[16].mxu1 %v683_v29  ;;  %v631_v39 = vmax.f32 %v503_v32, 0.0 }
 0x141   :  { %v509_v38 = vadd.f32 %v508_v37, %v1661_v22  ;;  %v632_v41 = vmax.f32 %v505_v34, 0.0 }
 0x142   :  { %v633_v40 = vmax.f32 %v507_v36, 0.0 }
 0x143   :  { %v634_v42 = vmax.f32 %v509_v38, 0.0 }
 0x144   :  { %v685_v43 = vpack.c.bf16 %v633_v40, %v631_v39 }
 0x145   :  { %v686_v44 = vpack.c.bf16 %v634_v42, %v632_v41  ;;  %v512_v45 = vpop.f32.mrb[24].mxu0 }
 0x146   :  { %v513_v46 = vadd.f32 %v512_v45, %v1659_v21  ;;  %v514_v47 = vpop.f32.mrb[25].mxu0 }
 0x147   :  { %v515_v48 = vadd.f32 %v514_v47, %v1661_v22  ;;  %v516_v49 = vpop.f32.mrb[26].mxu0  ;;  %914 = vmatprep.mubr.bf16.mxu1 %v686_v44 }
 0x148   :  { %v517_v50 = vadd.f32 %v516_v49, %v1659_v21  ;;  %v518_v51 = vpop.f32.mrb[27].mxu0  ;;  %915 = vmatmul.mubr.bf16.gmra.mrb[20].mxu1 %v685_v43  ;;  %v635_v53 = vmax.f32 %v513_v46, 0.0 }
 0x149   :  { %v519_v52 = vadd.f32 %v518_v51, %v1661_v22  ;;  %v636_v55 = vmax.f32 %v515_v48, 0.0 }
 0x14a   :  { %v637_v54 = vmax.f32 %v517_v50, 0.0 }
 0x14b   :  { %v638_v56 = vmax.f32 %v519_v52, 0.0 }
 0x14c   :  { %v687_v57 = vpack.c.bf16 %v637_v54, %v635_v53 }
 0x14d   :  { %v688_v58 = vpack.c.bf16 %v638_v56, %v636_v55  ;;  %v522_v59 = vpop.f32.mrb[28].mxu0 }
 0x14e   :  { %v523_v60 = vadd.f32 %v522_v59, %v1659_v21  ;;  %v524_v61 = vpop.f32.mrb[29].mxu0 }
 0x14f   :  { %v525_v62 = vadd.f32 %v524_v61, %v1661_v22  ;;  %v526_v63 = vpop.f32.mrb[30].mxu0  ;;  %922 = vmatprep.mubr.bf16.mxu1 %v688_v58 }
 0x150   :  { %v527_v0 = vadd.f32 %v526_v63, %v1659_v21  ;;  %v528_v1 = vpop.f32.mrb[31].mxu0  ;;  %923 = vmatmul.mubr.bf16.gmra.mrb[24].mxu1 %v687_v57  ;;  %v639_v3 = vmax.f32 %v523_v60, 0.0 }
 0x151   :  { %v529_v2 = vadd.f32 %v528_v1, %v1661_v22  ;;  %v640_v5 = vmax.f32 %v525_v62, 0.0 }
 0x152   :  { %v641_v4 = vmax.f32 %v527_v0, 0.0 }
 0x153   :  { %v642_v6 = vmax.f32 %v529_v2, 0.0 }
 0x154   :  { %v689_v7 = vpack.c.bf16 %v641_v4, %v639_v3 }
 0x155   :  { %v690_v8 = vpack.c.bf16 %v642_v6, %v640_v5  ;;  %v532_v9 = vpop.f32.mrb[32].mxu0 }
 0x156   :  { %v533_v10 = vadd.f32 %v532_v9, %v1659_v21  ;;  %v534_v11 = vpop.f32.mrb[33].mxu0 }
 0x157   :  { %v535_v12 = vadd.f32 %v534_v11, %v1661_v22  ;;  %v536_v13 = vpop.f32.mrb[34].mxu0  ;;  %930 = vmatprep.mubr.bf16.mxu1 %v690_v8 }
 0x158   :  { %v537_v14 = vadd.f32 %v536_v13, %v1659_v21  ;;  %v538_v15 = vpop.f32.mrb[35].mxu0  ;;  %931 = vmatmul.mubr.bf16.gmra.mrb[28].mxu1 %v689_v7  ;;  %v643_v17 = vmax.f32 %v533_v10, 0.0 }
 0x159   :  { %v539_v16 = vadd.f32 %v538_v15, %v1661_v22  ;;  %v644_v19 = vmax.f32 %v535_v12, 0.0 }
 0x15a   :  { %v645_v18 = vmax.f32 %v537_v14, 0.0 }
 0x15b   :  { %v646_v20 = vmax.f32 %v539_v16, 0.0 }
 0x15c   :  { %v691_v23 = vpack.c.bf16 %v645_v18, %v643_v17 }
 0x15d   :  { %v692_v24 = vpack.c.bf16 %v646_v20, %v644_v19  ;;  %v542_v25 = vpop.f32.mrb[36].mxu0 }
 0x15e   :  { %v543_v26 = vadd.f32 %v542_v25, %v1659_v21  ;;  %v544_v27 = vpop.f32.mrb[37].mxu0 }
 0x15f   :  { %v545_v28 = vadd.f32 %v544_v27, %v1661_v22  ;;  %v546_v29 = vpop.f32.mrb[38].mxu0  ;;  %938 = vmatprep.mubr.bf16.mxu1 %v692_v24 }
 0x160   :  { %v547_v30 = vadd.f32 %v546_v29, %v1659_v21  ;;  %v548_v31 = vpop.f32.mrb[39].mxu0  ;;  %939 = vmatmul.mubr.bf16.gmra.mrb[32].mxu1 %v691_v23  ;;  %v647_v33 = vmax.f32 %v543_v26, 0.0 }
 0x161   :  { %v549_v32 = vadd.f32 %v548_v31, %v1661_v22  ;;  %v648_v35 = vmax.f32 %v545_v28, 0.0 }
 0x162   :  { %v649_v34 = vmax.f32 %v547_v30, 0.0 }
 0x163   :  { %v650_v36 = vmax.f32 %v549_v32, 0.0 }
 0x164   :  { %v693_v37 = vpack.c.bf16 %v649_v34, %v647_v33 }
 0x165   :  { %v694_v38 = vpack.c.bf16 %v650_v36, %v648_v35  ;;  %v552_v39 = vpop.f32.mrb[40].mxu0 }
 0x166   :  { %v553_v40 = vadd.f32 %v552_v39, %v1659_v21  ;;  %v554_v41 = vpop.f32.mrb[41].mxu0 }
 0x167   :  { %v555_v42 = vadd.f32 %v554_v41, %v1661_v22  ;;  %v556_v43 = vpop.f32.mrb[42].mxu0  ;;  %946 = vmatprep.mubr.bf16.mxu1 %v694_v38 }
 0x168   :  { %v557_v44 = vadd.f32 %v556_v43, %v1659_v21  ;;  %v558_v45 = vpop.f32.mrb[43].mxu0  ;;  %947 = vmatmul.mubr.bf16.gmra.mrb[36].mxu1 %v693_v37  ;;  %v651_v47 = vmax.f32 %v553_v40, 0.0 }
 0x169   :  { %v559_v46 = vadd.f32 %v558_v45, %v1661_v22  ;;  %v652_v49 = vmax.f32 %v555_v42, 0.0 }
 0x16a   :  { %v653_v48 = vmax.f32 %v557_v44, 0.0 }
 0x16b   :  { %v654_v50 = vmax.f32 %v559_v46, 0.0 }
 0x16c   :  { %v695_v51 = vpack.c.bf16 %v653_v48, %v651_v47 }
 0x16d   :  { %v696_v52 = vpack.c.bf16 %v654_v50, %v652_v49  ;;  %v562_v53 = vpop.f32.mrb[44].mxu0 }
 0x16e   :  { %v563_v54 = vadd.f32 %v562_v53, %v1659_v21  ;;  %v564_v55 = vpop.f32.mrb[45].mxu0 }
 0x16f   :  { %v565_v56 = vadd.f32 %v564_v55, %v1661_v22  ;;  %v566_v57 = vpop.f32.mrb[46].mxu0  ;;  %954 = vmatprep.mubr.bf16.mxu1 %v696_v52 }
 0x170   :  { %v567_v58 = vadd.f32 %v566_v57, %v1659_v21  ;;  %v568_v59 = vpop.f32.mrb[47].mxu0  ;;  %955 = vmatmul.mubr.bf16.gmra.mrb[40].mxu1 %v695_v51  ;;  %v655_v61 = vmax.f32 %v563_v54, 0.0 }
 0x171   :  { %v569_v60 = vadd.f32 %v568_v59, %v1661_v22  ;;  %v656_v63 = vmax.f32 %v565_v56, 0.0 }
 0x172   :  { %v657_v62 = vmax.f32 %v567_v58, 0.0 }
 0x173   :  { %v658_v0 = vmax.f32 %v569_v60, 0.0 }
 0x174   :  { %v697_v1 = vpack.c.bf16 %v657_v62, %v655_v61  ;;  %v1730_v62 = vld [vmem:[%s1780_s4] ss:$0 sm:$0xff]  ;;  %s1383_s4 = smov [#allocation2]  }
 0x175   :  { %v698_v2 = vpack.c.bf16 %v658_v0, %v656_v63  ;;  %v572_v3 = vpop.f32.mrb[48].mxu0  ;;  %s1040_s25 = sshll.u32 %s1383_s4, 4  ;;  %s1041_s25 = int_to_ptr.vmem [resolvable:$true] %s1040_s25 }
 0x176   :  { %v573_v4 = vadd.f32 %v572_v3, %v1659_v21  ;;  %v574_v5 = vpop.f32.mrb[49].mxu0  ;;  %s1359_s26 = scalar_lea.vmem %s1041_s25, 4096  ;;  %p1364_p1 = scmp.lt.s32.totalorder %s1041_s25, %s1041_s25 }
 0x177   :  { %v575_v6 = vadd.f32 %v574_v5, %v1661_v22  ;;  %v576_v7 = vpop.f32.mrb[50].mxu0  ;;  %962 = vmatprep.mubr.bf16.mxu1 %v698_v2  ;;  %p1360_p0 = scmp.ne.s32.totalorder %s1041_s25, %s1359_s26  ;;  %p1365_p2 = scmp.lt.s32.totalorder %s1359_s26, %s1359_s26 }
 0x178   :  { %v577_v8 = vadd.f32 %v576_v7, %v1659_v21  ;;  %v578_v9 = vpop.f32.mrb[51].mxu0  ;;  %963 = vmatmul.mubr.bf16.gmra.mrb[44].mxu1 %v697_v1  ;;  %v659_v11 = vmax.f32 %v573_v4, 0.0 }
 0x179   :  { %v579_v10 = vadd.f32 %v578_v9, %v1661_v22  ;;  %v660_v13 = vmax.f32 %v575_v6, 0.0  ;;  %p1366_p3 = por %p1365_p2, %p1364_p1 }
 0x17a   :  { %v661_v12 = vmax.f32 %v577_v8, 0.0 }
 0x17b   :  { %v662_v14 = vmax.f32 %v579_v10, 0.0  ;;  %p1367_p4 = pnand %p1366_p3, %p1360_p0 }
 0x17c   :  { %v699_v15 = vpack.c.bf16 %v661_v12, %v659_v11 }
 0x17d   :  { %v700_v16 = vpack.c.bf16 %v662_v14, %v660_v13  ;;  %v582_v17 = vpop.f32.mrb[52].mxu0 }
 0x17e   :  { %v583_v18 = vadd.f32 %v582_v17, %v1659_v21  ;;  %v584_v19 = vpop.f32.mrb[53].mxu0 }
 0x17f   :  { %v585_v20 = vadd.f32 %v584_v19, %v1661_v22  ;;  %v586_v23 = vpop.f32.mrb[54].mxu0  ;;  %970 = vmatprep.mubr.bf16.mxu1 %v700_v16 }
 0x180   :  { %v587_v24 = vadd.f32 %v586_v23, %v1659_v21  ;;  %v588_v25 = vpop.f32.mrb[55].mxu0  ;;  %971 = vmatmul.mubr.bf16.gmra.mrb[48].mxu1 %v699_v15  ;;  %v663_v27 = vmax.f32 %v583_v18, 0.0 }
 0x181   :  { %v589_v26 = vadd.f32 %v588_v25, %v1661_v22  ;;  %v664_v29 = vmax.f32 %v585_v20, 0.0 }
 0x182   :  { %v665_v28 = vmax.f32 %v587_v24, 0.0 }
 0x183   :  { %v666_v30 = vmax.f32 %v589_v26, 0.0 }
 0x184   :  { %v701_v31 = vpack.c.bf16 %v665_v28, %v663_v27 }
 0x185   :  { %v702_v32 = vpack.c.bf16 %v666_v30, %v664_v29  ;;  %v592_v33 = vpop.f32.mrb[56].mxu0 }
 0x186   :  { %v593_v34 = vadd.f32 %v592_v33, %v1659_v21  ;;  %v594_v35 = vpop.f32.mrb[57].mxu0 }
 0x187   :  { %v595_v36 = vadd.f32 %v594_v35, %v1661_v22  ;;  %v596_v37 = vpop.f32.mrb[58].mxu0  ;;  %978 = vmatprep.mubr.bf16.mxu1 %v702_v32 }
 0x188   :  { %v597_v38 = vadd.f32 %v596_v37, %v1659_v21  ;;  %v598_v39 = vpop.f32.mrb[59].mxu0  ;;  %979 = vmatmul.mubr.bf16.gmra.mrb[52].mxu1 %v701_v31  ;;  %v667_v41 = vmax.f32 %v593_v34, 0.0 }
 0x189   :  { %v599_v40 = vadd.f32 %v598_v39, %v1661_v22  ;;  %v668_v43 = vmax.f32 %v595_v36, 0.0 }
 0x18a   :  { %v669_v42 = vmax.f32 %v597_v38, 0.0 }
 0x18b   :  { %v670_v44 = vmax.f32 %v599_v40, 0.0 }
 0x18c   :  { %v703_v45 = vpack.c.bf16 %v669_v42, %v667_v41 }
 0x18d   :  { %v704_v46 = vpack.c.bf16 %v670_v44, %v668_v43  ;;  %v602_v47 = vpop.f32.mrb[60].mxu0 }
 0x18e   :  { %v603_v48 = vadd.f32 %v602_v47, %v1659_v21  ;;  %v604_v49 = vpop.f32.mrb[61].mxu0 }
 0x18f   :  { %v605_v50 = vadd.f32 %v604_v49, %v1661_v22  ;;  %v606_v51 = vpop.f32.mrb[62].mxu0  ;;  %986 = vmatprep.mubr.bf16.mxu1 %v704_v46 }
 0x190   :  { %v607_v52 = vadd.f32 %v606_v51, %v1659_v21  ;;  %v608_v53 = vpop.f32.mrb[63].mxu0  ;;  %987 = vmatmul.mubr.bf16.gmra.mrb[56].mxu1 %v703_v45  ;;  %v671_v55 = vmax.f32 %v603_v48, 0.0 }
 0x191   :  { %v609_v54 = vadd.f32 %v608_v53, %v1661_v22  ;;  %v672_v57 = vmax.f32 %v605_v50, 0.0 }
 0x192   :  { %v673_v56 = vmax.f32 %v607_v52, 0.0 }
 0x193   :  { %v674_v58 = vmax.f32 %v609_v54, 0.0 }
 0x194   :  { %v705_v59 = vpack.c.bf16 %v673_v56, %v671_v55 }
 0x195   :  { %v706_v60 = vpack.c.bf16 %v674_v58, %v672_v57 }
 0x197   :  { %994 = vmatprep.mubr.bf16.mxu1 %v706_v60 }
 0x198   :  { %995 = vmatmul.mubr.bf16.gmra.mrb[60].mxu1 %v705_v59 }
 0x1f3   :  { %v1148_v61 = vpop.f32.mrb[0].mxu1 }
 0x1f4   :  { %v1149_v63 = vpop.f32.mrb[1].mxu1 }
 0x1f5   :  { %v1150_v21 = vadd.f32 %v1149_v63, %v1148_v61  ;;  %v1151_v0 = vpop.f32.mrb[2].mxu1 }
 0x1f6   :  { %v1152_v1 = vpop.f32.mrb[3].mxu1 }
 0x1f7   :  { %v877_v22 = vadd.f32 %v1150_v21, %v1730_v62  ;;  %v1153_v2 = vadd.f32 %v1152_v1, %v1151_v0 }
 0x1f9   :  { %1003 = vst [vmem:[#allocation2] sm:$0xff] %v877_v22  ;;  %v880_v3 = vadd.f32 %v1153_v2, %v1730_v62 }
 0x1fb   :  { %1004 = vst [vmem:[#allocation2 + $0x8] sm:$0xff] %v880_v3  ;;  %v1154_v4 = vpop.f32.mrb[4].mxu1 }
 0x1fc   :  { %v1155_v5 = vpop.f32.mrb[5].mxu1 }
 0x1fd   :  { %v1156_v6 = vadd.f32 %v1155_v5, %v1154_v4  ;;  %v1157_v7 = vpop.f32.mrb[6].mxu1 }
 0x1fe   :  { %v1158_v8 = vpop.f32.mrb[7].mxu1 }
 0x1ff   :  { %v885_v9 = vadd.f32 %v1156_v6, %v1730_v62  ;;  %v1159_v10 = vadd.f32 %v1158_v8, %v1157_v7 }
 0x201   :  { %1005 = vst [vmem:[#allocation2 + $0x10] sm:$0xff] %v885_v9  ;;  %v888_v11 = vadd.f32 %v1159_v10, %v1730_v62 }
 0x203   :  { %1006 = vst [vmem:[#allocation2 + $0x18] sm:$0xff] %v888_v11  ;;  %v1160_v12 = vpop.f32.mrb[8].mxu1 }
 0x204   :  { %v1161_v13 = vpop.f32.mrb[9].mxu1 }
 0x205   :  { %v1162_v14 = vadd.f32 %v1161_v13, %v1160_v12  ;;  %v1163_v15 = vpop.f32.mrb[10].mxu1 }
 0x206   :  { %v1164_v16 = vpop.f32.mrb[11].mxu1 }
 0x207   :  { %v893_v17 = vadd.f32 %v1162_v14, %v1730_v62  ;;  %v1165_v18 = vadd.f32 %v1164_v16, %v1163_v15 }
 0x209   :  { %1007 = vst [vmem:[#allocation2 + $0x20] sm:$0xff] %v893_v17  ;;  %v896_v19 = vadd.f32 %v1165_v18, %v1730_v62 }
 0x20b   :  { %1008 = vst [vmem:[#allocation2 + $0x28] sm:$0xff] %v896_v19  ;;  %v1166_v20 = vpop.f32.mrb[12].mxu1 }
 0x20c   :  { %v1167_v23 = vpop.f32.mrb[13].mxu1 }
 0x20d   :  { %v1168_v24 = vadd.f32 %v1167_v23, %v1166_v20  ;;  %v1169_v25 = vpop.f32.mrb[14].mxu1 }
 0x20e   :  { %v1170_v26 = vpop.f32.mrb[15].mxu1 }
 0x20f   :  { %v901_v27 = vadd.f32 %v1168_v24, %v1730_v62  ;;  %v1171_v28 = vadd.f32 %v1170_v26, %v1169_v25 }
 0x211   :  { %1009 = vst [vmem:[#allocation2 + $0x30] sm:$0xff] %v901_v27  ;;  %v904_v29 = vadd.f32 %v1171_v28, %v1730_v62 }
 0x213   :  { %1010 = vst [vmem:[#allocation2 + $0x38] sm:$0xff] %v904_v29  ;;  %v1172_v30 = vpop.f32.mrb[16].mxu1 }
 0x214   :  { %v1173_v31 = vpop.f32.mrb[17].mxu1 }
 0x215   :  { %v1174_v32 = vadd.f32 %v1173_v31, %v1172_v30  ;;  %v1175_v33 = vpop.f32.mrb[18].mxu1 }
 0x216   :  { %v1176_v34 = vpop.f32.mrb[19].mxu1 }
 0x217   :  { %v909_v35 = vadd.f32 %v1174_v32, %v1730_v62  ;;  %v1177_v36 = vadd.f32 %v1176_v34, %v1175_v33 }
 0x219   :  { %1011 = vst [vmem:[#allocation2 + $0x40] sm:$0xff] %v909_v35  ;;  %v912_v37 = vadd.f32 %v1177_v36, %v1730_v62 }
 0x21b   :  { %1012 = vst [vmem:[#allocation2 + $0x48] sm:$0xff] %v912_v37  ;;  %v1178_v38 = vpop.f32.mrb[20].mxu1 }
 0x21c   :  { %v1179_v39 = vpop.f32.mrb[21].mxu1 }
 0x21d   :  { %v1180_v40 = vadd.f32 %v1179_v39, %v1178_v38  ;;  %v1181_v41 = vpop.f32.mrb[22].mxu1 }
 0x21e   :  { %v1182_v42 = vpop.f32.mrb[23].mxu1 }
 0x21f   :  { %v917_v43 = vadd.f32 %v1180_v40, %v1730_v62  ;;  %v1183_v44 = vadd.f32 %v1182_v42, %v1181_v41 }
 0x221   :  { %1013 = vst [vmem:[#allocation2 + $0x50] sm:$0xff] %v917_v43  ;;  %v920_v45 = vadd.f32 %v1183_v44, %v1730_v62 }
 0x223   :  { %1014 = vst [vmem:[#allocation2 + $0x58] sm:$0xff] %v920_v45  ;;  %v1184_v46 = vpop.f32.mrb[24].mxu1 }
 0x224   :  { %v1185_v47 = vpop.f32.mrb[25].mxu1 }
 0x225   :  { %v1186_v48 = vadd.f32 %v1185_v47, %v1184_v46  ;;  %v1187_v49 = vpop.f32.mrb[26].mxu1 }
 0x226   :  { %v1188_v50 = vpop.f32.mrb[27].mxu1 }
 0x227   :  { %v925_v51 = vadd.f32 %v1186_v48, %v1730_v62  ;;  %v1189_v52 = vadd.f32 %v1188_v50, %v1187_v49 }
 0x229   :  { %1015 = vst [vmem:[#allocation2 + $0x60] sm:$0xff] %v925_v51  ;;  %v928_v53 = vadd.f32 %v1189_v52, %v1730_v62 }
 0x22b   :  { %1016 = vst [vmem:[#allocation2 + $0x68] sm:$0xff] %v928_v53  ;;  %v1190_v54 = vpop.f32.mrb[28].mxu1 }
 0x22c   :  { %v1191_v55 = vpop.f32.mrb[29].mxu1 }
 0x22d   :  { %v1192_v56 = vadd.f32 %v1191_v55, %v1190_v54  ;;  %v1193_v57 = vpop.f32.mrb[30].mxu1 }
 0x22e   :  { %v1194_v58 = vpop.f32.mrb[31].mxu1 }
 0x22f   :  { %v933_v59 = vadd.f32 %v1192_v56, %v1730_v62  ;;  %v1195_v60 = vadd.f32 %v1194_v58, %v1193_v57 }
 0x231   :  { %1017 = vst [vmem:[#allocation2 + $0x70] sm:$0xff] %v933_v59  ;;  %v936_v61 = vadd.f32 %v1195_v60, %v1730_v62 }
 0x233   :  { %1018 = vst [vmem:[#allocation2 + $0x78] sm:$0xff] %v936_v61  ;;  %v1196_v63 = vpop.f32.mrb[32].mxu1 }
 0x234   :  { %v1197_v21 = vpop.f32.mrb[33].mxu1 }
 0x235   :  { %v1198_v0 = vadd.f32 %v1197_v21, %v1196_v63  ;;  %v1199_v1 = vpop.f32.mrb[34].mxu1 }
 0x236   :  { %v1200_v22 = vpop.f32.mrb[35].mxu1 }
 0x237   :  { %v941_v2 = vadd.f32 %v1198_v0, %v1730_v62  ;;  %v1201_v3 = vadd.f32 %v1200_v22, %v1199_v1 }
 0x239   :  { %1019 = vst [vmem:[#allocation2 + $0x80] sm:$0xff] %v941_v2  ;;  %v944_v4 = vadd.f32 %v1201_v3, %v1730_v62 }
 0x23b   :  { %1020 = vst [vmem:[#allocation2 + $0x88] sm:$0xff] %v944_v4  ;;  %v1202_v5 = vpop.f32.mrb[36].mxu1 }
 0x23c   :  { %v1203_v6 = vpop.f32.mrb[37].mxu1 }
 0x23d   :  { %v1204_v7 = vadd.f32 %v1203_v6, %v1202_v5  ;;  %v1205_v8 = vpop.f32.mrb[38].mxu1 }
 0x23e   :  { %v1206_v9 = vpop.f32.mrb[39].mxu1 }
 0x23f   :  { %v949_v10 = vadd.f32 %v1204_v7, %v1730_v62  ;;  %v1207_v11 = vadd.f32 %v1206_v9, %v1205_v8 }
 0x241   :  { %1021 = vst [vmem:[#allocation2 + $0x90] sm:$0xff] %v949_v10  ;;  %v952_v12 = vadd.f32 %v1207_v11, %v1730_v62 }
 0x243   :  { %1022 = vst [vmem:[#allocation2 + $0x98] sm:$0xff] %v952_v12  ;;  %v1208_v13 = vpop.f32.mrb[40].mxu1 }
 0x244   :  { %v1209_v14 = vpop.f32.mrb[41].mxu1 }
 0x245   :  { %v1210_v15 = vadd.f32 %v1209_v14, %v1208_v13  ;;  %v1211_v16 = vpop.f32.mrb[42].mxu1 }
 0x246   :  { %v1212_v17 = vpop.f32.mrb[43].mxu1 }
 0x247   :  { %v957_v18 = vadd.f32 %v1210_v15, %v1730_v62  ;;  %v1213_v19 = vadd.f32 %v1212_v17, %v1211_v16 }
 0x249   :  { %1023 = vst [vmem:[#allocation2 + $0xa0] sm:$0xff] %v957_v18  ;;  %v960_v20 = vadd.f32 %v1213_v19, %v1730_v62 }
 0x24b   :  { %1024 = vst [vmem:[#allocation2 + $0xa8] sm:$0xff] %v960_v20  ;;  %v1214_v23 = vpop.f32.mrb[44].mxu1 }
 0x24c   :  { %v1215_v24 = vpop.f32.mrb[45].mxu1 }
 0x24d   :  { %v1216_v25 = vadd.f32 %v1215_v24, %v1214_v23  ;;  %v1217_v26 = vpop.f32.mrb[46].mxu1 }
 0x24e   :  { %v1218_v27 = vpop.f32.mrb[47].mxu1 }
 0x24f   :  { %v965_v28 = vadd.f32 %v1216_v25, %v1730_v62  ;;  %v1219_v29 = vadd.f32 %v1218_v27, %v1217_v26 }
 0x251   :  { %1025 = vst [vmem:[#allocation2 + $0xb0] sm:$0xff] %v965_v28  ;;  %v968_v30 = vadd.f32 %v1219_v29, %v1730_v62 }
 0x253   :  { %1026 = vst [vmem:[#allocation2 + $0xb8] sm:$0xff] %v968_v30  ;;  %v1220_v31 = vpop.f32.mrb[48].mxu1 }
 0x254   :  { %v1221_v32 = vpop.f32.mrb[49].mxu1 }
 0x255   :  { %v1222_v33 = vadd.f32 %v1221_v32, %v1220_v31  ;;  %v1223_v34 = vpop.f32.mrb[50].mxu1 }
 0x256   :  { %v1224_v35 = vpop.f32.mrb[51].mxu1 }
 0x257   :  { %v973_v36 = vadd.f32 %v1222_v33, %v1730_v62  ;;  %v1225_v37 = vadd.f32 %v1224_v35, %v1223_v34 }
 0x259   :  { %1027 = vst [vmem:[#allocation2 + $0xc0] sm:$0xff] %v973_v36  ;;  %v976_v38 = vadd.f32 %v1225_v37, %v1730_v62 }
 0x25b   :  { %1028 = vst [vmem:[#allocation2 + $0xc8] sm:$0xff] %v976_v38  ;;  %v1226_v39 = vpop.f32.mrb[52].mxu1 }
 0x25c   :  { %v1227_v40 = vpop.f32.mrb[53].mxu1 }
 0x25d   :  { %v1228_v41 = vadd.f32 %v1227_v40, %v1226_v39  ;;  %v1229_v42 = vpop.f32.mrb[54].mxu1 }
 0x25e   :  { %v1230_v43 = vpop.f32.mrb[55].mxu1 }
 0x25f   :  { %v981_v44 = vadd.f32 %v1228_v41, %v1730_v62  ;;  %v1231_v45 = vadd.f32 %v1230_v43, %v1229_v42 }
 0x261   :  { %1029 = vst [vmem:[#allocation2 + $0xd0] sm:$0xff] %v981_v44  ;;  %v984_v46 = vadd.f32 %v1231_v45, %v1730_v62 }
 0x263   :  { %1030 = vst [vmem:[#allocation2 + $0xd8] sm:$0xff] %v984_v46  ;;  %v1232_v47 = vpop.f32.mrb[56].mxu1 }
 0x264   :  { %v1233_v48 = vpop.f32.mrb[57].mxu1 }
 0x265   :  { %v1234_v49 = vadd.f32 %v1233_v48, %v1232_v47  ;;  %v1235_v50 = vpop.f32.mrb[58].mxu1 }
 0x266   :  { %v1236_v51 = vpop.f32.mrb[59].mxu1 }
 0x267   :  { %v989_v52 = vadd.f32 %v1234_v49, %v1730_v62  ;;  %v1237_v53 = vadd.f32 %v1236_v51, %v1235_v50 }
 0x269   :  { %1031 = vst [vmem:[#allocation2 + $0xe0] sm:$0xff] %v989_v52  ;;  %v992_v54 = vadd.f32 %v1237_v53, %v1730_v62 }
 0x26b   :  { %1032 = vst [vmem:[#allocation2 + $0xe8] sm:$0xff] %v992_v54  ;;  %v1238_v55 = vpop.f32.mrb[60].mxu1 }
 0x26c   :  { %v1239_v56 = vpop.f32.mrb[61].mxu1 }
 0x26d   :  { %v1240_v57 = vadd.f32 %v1239_v56, %v1238_v55  ;;  %v1241_v58 = vpop.f32.mrb[62].mxu1 }
 0x26e   :  { %v1242_v59 = vpop.f32.mrb[63].mxu1 }
 0x26f   :  { %v997_v60 = vadd.f32 %v1240_v57, %v1730_v62  ;;  %v1243_v61 = vadd.f32 %v1242_v59, %v1241_v58 }
 0x271   :  { %1033 = vst [vmem:[#allocation2 + $0xf0] sm:$0xff] %v997_v60  ;;  %v1000_v63 = vadd.f32 %v1243_v61, %v1730_v62 }
 0x273   :  { %1034 = vst [vmem:[#allocation2 + $0xf8] sm:$0xff] %v1000_v63 }
 0x274   :  { %1370 = shalt.err (!%p1367_p4)
}
 0x275   :  { %s1371_s29 = scalar_lea.hbm %s1781_s5, 4096 }
 0x276   :  { %p1372_p5 = scmp.ne.s32.totalorder %s1781_s5, %s1371_s29  ;;  %p1375_p6 = scmp.lt.u32.totalorder %s1371_s29, %s1781_s5 }
 0x278   :  { %p1377_p7 = pnand %p1375_p6, %p1372_p5 }
 0x27a   :  { %1380 = shalt.err (!%p1377_p7)
}
 0x27b   :  { %s1384_s9 = smov 128   ;;  %s1385_s10 = smov 8  }
 0x27c   :  { %1046 = dma.vmem_to_hbm [thread:$0]  %s1041_s25, 4096, %s1781_s5, [#allocation3], %s1384_s9, %s1384_s9, %s1385_s10  }
 0x27d   :  { %1381 = dma.done.wait [#allocation3], 4096  }
 0x27e   :  { %1382 = vsyncadd [#allocation3], 4294963200 }
 0x27f   :  { %1050 = vsyncpa [#allocation3], 1 }

</bundles_post_ra>
